<compile_context>
chip_gen: v7x
topology: tpu7x:2x2x1
jax: 0.10.0
libtpu: 0.0.40
codegen_flags: <defaults>
</compile_context>

<pallas_src>
import functools

import jax
import jax.numpy as jnp
from jax import lax
from jax.experimental import pallas as pl
from jax.experimental.pallas import tpu as pltpu


_VMEM = pl.BlockSpec(memory_space=pltpu.MemorySpace.VMEM)


def _round_up(x, m):
    return ((x + m - 1) // m) * m


def _pad2d(a, rows, cols):
    return jnp.pad(a, ((0, rows - a.shape[0]), (0, cols - a.shape[1])))


def _nbytes(a):
    return int(a.size) * a.dtype.itemsize


# ---------------------------------------------------------------------------
# Fused Pallas kernel (whole forward in one call)
# ---------------------------------------------------------------------------
def _fused_forward_kernel(keys_ref, vals_ref, tgt_ref,                     # VMEM int32
                          ek_ref, ev_ref, a_ref, w_ref, p_ref, wout_ref,   # VMEM
                          o_ref,                                           # VMEM out
                          x_sc,                                            # VMEM scratch
                          *, n_pad, num_layers, h_dim, hp, eps,
                          use_activation, use_residual, use_layer_norm):
    dim0_pad = ek_ref.shape[0]

    # ---- layer0: x = relu(Ek[key] + Ev[val]) as one-hot MXU gathers -------------
    # Padded node rows carry id = -1 -> all-zero one-hot row -> zero features.
    # Exact (0/1 weights, f32 accumulation) so it matches an index gather bit-for-bit.
    # TODO(synk): for very large vocabularies switch to a DMA row-gather
    # (PrefetchScalarGridSpec + pl.Element) instead of the (N, dim0) one-hot.
    vocab_iota = lax.broadcasted_iota(jnp.int32, (n_pad, dim0_pad), 1)
    ohk = (keys_ref[...] == vocab_iota).astype(jnp.float32)
    ohv = (vals_ref[...] == vocab_iota).astype(jnp.float32)
    x0 = (jnp.dot(ohk, ek_ref[...], preferred_element_type=jnp.float32)
          + jnp.dot(ohv, ev_ref[...], preferred_element_type=jnp.float32))
    x_sc[...] = jnp.maximum(x0, 0.0)                                   # layer0_ff = nn.ReLU()

    # Lane mask selecting the true hidden dim (padded lanes excluded from LN stats).
    lane_mask = lax.broadcasted_iota(jnp.int32, (1, hp), 1) < h_dim
    inv_h = 1.0 / float(h_dim)

    # ---- GNN layers (x stays resident in VMEM scratch across layers) ------------
    def layer_body(l, carry):
        x = x_sc[...]                                                  # (Np, Hp) f32
        w = w_ref[l]                                                   # (Hp, Hp) bf16
        prm = p_ref[l]                                                 # (8, Hp) f32, one aligned tile
        b, gamma, beta = prm[0:1, :], prm[1:2, :], prm[2:3, :]

        # GCNConv: (A_norm @ x) @ W + b.  a_ref read inside the dot (no hoisted copy).
        h = jnp.dot(a_ref[...], x.astype(jnp.bfloat16),
                    preferred_element_type=jnp.float32)
        z = jnp.dot(h.astype(jnp.bfloat16), w,
                    preferred_element_type=jnp.float32) + b
        if use_activation:
            z = jnp.maximum(z, 0.0)                                    # F.relu
        y = x + z if use_residual else z
        if use_layer_norm:
            # Two-pass LayerNorm in f32 over the true h_dim (padded lanes masked out).
            mean = jnp.sum(y, axis=-1, keepdims=True) * inv_h
            centered = jnp.where(lane_mask, y - mean, 0.0)
            var = jnp.sum(centered * centered, axis=-1, keepdims=True) * inv_h
            y = centered * lax.rsqrt(var + eps) * gamma + beta
        # TODO(synk): reference calls F.dropout(x) with training=True (stochastic even at
        # eval); implemented as identity (inference semantics).
        x_sc[...] = y
        return carry

    lax.fori_loop(0, num_layers, layer_body, 0, unroll=True)

    # ---- target gather as one-hot selection matmul + out projection -------------
    # Padded target slots carry id = -1 -> zero selection row -> zero logits (sliced off).
    t_pad = tgt_ref.shape[0]
    node_iota = lax.broadcasted_iota(jnp.int32, (t_pad, n_pad), 1)
    sel = (tgt_ref[...] == node_iota).astype(jnp.bfloat16)             # (Tp, Np)
    t = jnp.dot(sel, x_sc[...].astype(jnp.bfloat16),
                preferred_element_type=jnp.float32)                    # (Tp, Hp)
    o_ref[...] = jnp.dot(t.astype(jnp.bfloat16), wout_ref[...],
                         preferred_element_type=jnp.float32)           # (Tp, OutP) lane-dense


# ---------------------------------------------------------------------------
# Model (parameter setup + glue in plain JAX, whole hot path in one Pallas call)
# ---------------------------------------------------------------------------
class GraphModelPallas:
    def __init__(self, num_layers, dim0, h_dim, out_dim,
                 layer_norm=True, use_activation=True, use_residual=True, key=None):
        self.num_layers = num_layers
        self.dim0 = dim0
        self.h_dim = h_dim
        self.out_dim = out_dim
        self.use_layer_norm = layer_norm
        self.use_activation = use_activation
        self.use_residual = use_residual

        # Lane-padded dims (MXU/vreg friendly).  Padded rows/cols are zeros so the
        # padded lanes of x stay exactly zero through every layer.
        self.hp = _round_up(h_dim, 128)
        self.outp = _round_up(out_dim, 128)
        self.dim0_pad = _round_up(dim0, 128)

        key = jax.random.PRNGKey(0) if key is None else key
        ks = jax.random.split(key, 3 + num_layers)
        # layer0 embeddings (num_embeddings=dim0, embedding_dim=h_dim) -- kept fp32.
        ek = jax.random.normal(ks[0], (dim0, h_dim), jnp.float32) * 0.1
        ev = jax.random.normal(ks[1], (dim0, h_dim), jnp.float32) * 0.1
        self.Ek = _pad2d(ek, self.dim0_pad, self.hp)
        self.Ev = _pad2d(ev, self.dim0_pad, self.hp)

        # GNN layers: weight (hp, hp) bf16; bias/gamma/beta packed into one aligned
        # (8, hp) f32 tile per layer (rows 0/1/2, rest zero) -> one unmasked load per layer.
        Ws, pkgs = [], []
        for i in range(num_layers):
            kw, kb = jax.random.split(ks[2 + i])
            W = jax.random.normal(kw, (h_dim, h_dim), jnp.float32) * (1.0 / jnp.sqrt(h_dim))
            b = jax.random.normal(kb, (h_dim,), jnp.float32) * 0.01
            pkg = jnp.zeros((8, self.hp), jnp.float32)
            pkg = pkg.at[0, :h_dim].set(b)        # bias
            pkg = pkg.at[1, :h_dim].set(1.0)      # LayerNorm gamma
            # row 2 (beta) stays zero; padded lanes of gamma/beta are zero on purpose.
            Ws.append(_pad2d(W, self.hp, self.hp))
            pkgs.append(pkg)
        self.W_stack = jnp.stack(Ws).astype(jnp.bfloat16)              # (L, Hp, Hp) bf16
        self.pkg_stack = jnp.stack(pkgs)                               # (L, 8, Hp)  f32
        # out_layer: Linear(h_dim, out_dim, bias=False); stored as (Hp, OutP) bf16.
        wout = jax.random.normal(ks[-1], (h_dim, out_dim), jnp.float32) * (1.0 / jnp.sqrt(h_dim))
        self.Wout = _pad2d(wout, self.hp, self.outp).astype(jnp.bfloat16)

    # -----------------------------------------------------------------------
    def precompute_adjacency(self, edge_index, num_nodes):
        """Dense GCN-normalized adjacency D^-1/2 (A + I_remaining) D^-1/2 with
        A[dst, src] += 1, padded to a multiple of 8 nodes and cast to bf16.
        Compute once per (static) graph and pass to forward(); re-running the
        O(N^2) scatter/normalize per call dwarfs the fused kernel itself."""
        n = num_nodes
        src, dst = edge_index[0], edge_index[1]
        A = jnp.zeros((n, n), jnp.float32).at[dst, src].add(1.0)        # keep multi-edges
        diag = jnp.diagonal(A)
        A = A + jnp.diag(jnp.where(diag > 0, 0.0, 1.0))                 # add_remaining_self_loops
        deg = jnp.sum(A, axis=1)
        dinv = lax.rsqrt(jnp.maximum(deg, 1e-12))
        A = A * dinv[:, None] * dinv[None, :]
        n_pad = _round_up(max(n, 8), 8)
        return _pad2d(A, n_pad, n_pad).astype(jnp.bfloat16)

    # -----------------------------------------------------------------------
    def forward(self, x_ids, edge_index, batch, target_mask, num_targets, a_norm=None):
        n = x_ids.shape[0]
        n_pad = _round_up(max(n, 8), 8)
        t_pad = _round_up(max(num_targets, 8), 8)

        # Node ids, padded rows get -1 -> zero one-hot row -> zero features.
        keys = jnp.full((n_pad, 1), -1, jnp.int32).at[:n, 0].set(x_ids[:, 0].astype(jnp.int32))
        vals = jnp.full((n_pad, 1), -1, jnp.int32).at[:n, 0].set(x_ids[:, 1].astype(jnp.int32))

        # Target row indices; padded / missing entries = -1 -> zero logit rows (sliced off).
        # NOTE: caller must pass the true target count for exact parity with x[target_mask].
        tgt_idx = jnp.nonzero(target_mask, size=num_targets, fill_value=-1)[0].astype(jnp.int32)
        tgt = jnp.full((t_pad, 1), -1, jnp.int32).at[:num_targets, 0].set(tgt_idx)

        if a_norm is None:
            a_norm = self.precompute_adjacency(edge_index, n)            # (n_pad, n_pad) bf16
        assert a_norm.shape == (n_pad, n_pad)

        kernel = functools.partial(
            _fused_forward_kernel,
            n_pad=n_pad, num_layers=self.num_layers, h_dim=self.h_dim, hp=self.hp,
            eps=1e-5, use_activation=self.use_activation,
            use_residual=self.use_residual, use_layer_norm=self.use_layer_norm)

        # VMEM budget: everything-resident design; raise the scoped limit explicitly
        # (v6e default 32 MiB / v5e 16 MiB are far below physical).
        resident = (_nbytes(keys) + _nbytes(vals) + _nbytes(tgt) + _nbytes(self.Ek)
                    + _nbytes(self.Ev) + _nbytes(a_norm) + _nbytes(self.W_stack)
                    + _nbytes(self.pkg_stack) + _nbytes(self.Wout)
                    + t_pad * self.outp * 4 + n_pad * self.hp * 4)
        vmem_limit = int(min(64 * 2**20, max(16 * 2**20, 2 * resident + (4 << 20))))

        L = self.num_layers
        flops = (4 * n_pad * self.dim0_pad * self.hp
                 + L * (2 * n_pad * n_pad * self.hp + 2 * n_pad * self.hp * self.hp)
                 + 2 * t_pad * n_pad * self.hp
                 + 2 * t_pad * self.hp * self.outp)
        cost = pl.CostEstimate(
            flops=int(flops),
            transcendentals=int(L * n_pad) if self.use_layer_norm else 0,
            bytes_accessed=int(resident))

        # TODO(synk): for large graphs (N beyond VMEM, esp. v7x's 64 MiB) move a_norm to
        # memory_space=pl.ANY and stream K-tiles via pltpu.emit_pipeline; on v7x also
        # row-split across the 2 TensorCores.  For many small graphs, batch them as a
        # block-diagonal adjacency caller-side instead of one launch per graph.
        logits_full = pl.pallas_call(
            kernel,
            out_shape=jax.ShapeDtypeStruct((t_pad, self.outp), jnp.float32),
            in_specs=[_VMEM] * 9,
            out_specs=_VMEM,
            scratch_shapes=[pltpu.VMEM((n_pad, self.hp), jnp.float32)],   # x, resident across layers
            compiler_params=pltpu.CompilerParams(vmem_limit_bytes=vmem_limit),
            cost_estimate=cost,
        )(keys, vals, tgt, self.Ek, self.Ev, a_norm,
          self.W_stack, self.pkg_stack, self.Wout)

        logits = logits_full[:num_targets, :self.out_dim]
        targets_batch = jnp.take(batch, jnp.maximum(tgt_idx, 0), axis=0)
        return logits, targets_batch


# ---------------------------------------------------------------------------
if __name__ == "__main__":
    # Small shapes consistent with the module's forward.
    N, E = 16, 32          # nodes, edges
    DIM0 = 8               # vocab size for key/value ids
    H_DIM = 32
    OUT_DIM = 8
    NUM_LAYERS = 2

    root = jax.random.PRNGKey(0)
    k_ids, k_src, k_dst, k_model = jax.random.split(root, 4)

    # data.x : (N, 2) int ids  [key, value]
    x_ids = jax.random.randint(k_ids, (N, 2), 0, DIM0, dtype=jnp.int32)
    # data.edge_index : (2, E)
    edge_index = jnp.stack([
        jax.random.randint(k_src, (E,), 0, N, dtype=jnp.int32),
        jax.random.randint(k_dst, (E,), 0, N, dtype=jnp.int32),
    ], axis=0)
    # data.batch : (N,)  two graphs of 8 nodes each
    batch = jnp.concatenate([jnp.zeros(8, jnp.int32), jnp.ones(8, jnp.int32)])
    # data.target_mask : (N,) — every other node is a target (8 targets)
    target_mask = (jnp.arange(N) % 2 == 0)
    num_targets = 8

    model = GraphModelPallas(NUM_LAYERS, DIM0, H_DIM, OUT_DIM,
                             layer_norm=True, use_activation=True, use_residual=True,
                             key=k_model)

    # Precompute the normalized adjacency once per graph and reuse it across forwards.
    a_norm = model.precompute_adjacency(edge_index, N)

    logits, targets_batch = model.forward(x_ids, edge_index, batch, target_mask,
                                          num_targets, a_norm=a_norm)
    jax.block_until_ready((logits, targets_batch))

    assert logits.shape == (num_targets, OUT_DIM)
    assert targets_batch.shape == (num_targets,)
    print("KERNEL_OK")
</pallas_src>

<mosaic_0001>
module attributes {stable_mosaic.version = 11 : i64} {
  func.func @_fused_forward_kernel(%arg0: memref<16x1xi32, #tpu.memory_space<vmem>>, %arg1: memref<16x1xi32, #tpu.memory_space<vmem>>, %arg2: memref<8x1xi32, #tpu.memory_space<vmem>>, %arg3: memref<128x128xf32, #tpu.memory_space<vmem>>, %arg4: memref<128x128xf32, #tpu.memory_space<vmem>>, %arg5: memref<16x16xbf16, #tpu.memory_space<vmem>>, %arg6: memref<2x128x128xbf16, #tpu.memory_space<vmem>>, %arg7: memref<2x8x128xf32, #tpu.memory_space<vmem>>, %arg8: memref<128x128xbf16, #tpu.memory_space<vmem>>, %arg9: memref<8x128xf32, #tpu.memory_space<vmem>>, %arg10: memref<16x128xf32, #tpu.memory_space<vmem>>) attributes {dimension_semantics = [], scalar_prefetch = 0 : i64, scratch_operands = 1 : i64, tpu.core_type = #tpu.core_type<tc>} {
    %0 = tpu.iota {dimensions = array<i32: 1>} : vector<16x128xi32>
    %c0 = arith.constant 0 : index
    %c0_0 = arith.constant 0 : index
    %1 = vector.load %arg0[%c0, %c0_0] : memref<16x1xi32, #tpu.memory_space<vmem>>, vector<16x1xi32>
    %2 = vector.broadcast %1 : vector<16x1xi32> to vector<16x128xi32>
    %3 = arith.cmpi eq, %2, %0 : vector<16x128xi32>
    %4 = arith.extui %3 : vector<16x128xi1> to vector<16x128xi32>
    %5 = arith.sitofp %4 : vector<16x128xi32> to vector<16x128xf32>
    %c0_1 = arith.constant 0 : index
    %c0_2 = arith.constant 0 : index
    %6 = vector.load %arg1[%c0_1, %c0_2] : memref<16x1xi32, #tpu.memory_space<vmem>>, vector<16x1xi32>
    %7 = vector.broadcast %6 : vector<16x1xi32> to vector<16x128xi32>
    %8 = arith.cmpi eq, %7, %0 : vector<16x128xi32>
    %9 = arith.extui %8 : vector<16x128xi1> to vector<16x128xi32>
    %10 = arith.sitofp %9 : vector<16x128xi32> to vector<16x128xf32>
    %c0_3 = arith.constant 0 : index
    %c0_4 = arith.constant 0 : index
    %11 = vector.load %arg3[%c0_3, %c0_4] : memref<128x128xf32, #tpu.memory_space<vmem>>, vector<128x128xf32>
    %cst = arith.constant dense<0.000000e+00> : vector<16x128xf32>
    %12 = tpu.matmul %5, %11, %cst {dimension_numbers = #tpu.dot_dimension_numbers<[1], [0], [0], [1], [0, 0, 1, 1], [], []>} : vector<16x128xf32>, vector<128x128xf32>, vector<16x128xf32> -> vector<16x128xf32>
    %c0_5 = arith.constant 0 : index
    %c0_6 = arith.constant 0 : index
    %13 = vector.load %arg4[%c0_5, %c0_6] : memref<128x128xf32, #tpu.memory_space<vmem>>, vector<128x128xf32>
    %cst_7 = arith.constant dense<0.000000e+00> : vector<16x128xf32>
    %14 = tpu.matmul %10, %13, %cst_7 {dimension_numbers = #tpu.dot_dimension_numbers<[1], [0], [0], [1], [0, 0, 1, 1], [], []>} : vector<16x128xf32>, vector<128x128xf32>, vector<16x128xf32> -> vector<16x128xf32>
    %15 = arith.addf %12, %14 : vector<16x128xf32>
    %cst_8 = arith.constant 0.000000e+00 : f32
    %16 = vector.broadcast %cst_8 : f32 to vector<16x128xf32>
    %17 = arith.maximumf %15, %16 : vector<16x128xf32>
    %c0_9 = arith.constant 0 : index
    %c0_10 = arith.constant 0 : index
    %18 = vector.load %arg10[%c0_9, %c0_10] : memref<16x128xf32, #tpu.memory_space<vmem>>, vector<16x128xf32>
    tpu.vector_store %arg10[%c0_9, %c0_10], %17 {strides = array<i32>} : memref<16x128xf32, #tpu.memory_space<vmem>>, vector<16x128xf32>,
    %19 = tpu.iota {dimensions = array<i32: 1>} : vector<1x128xi32>
    %c32_i32 = arith.constant 32 : i32
    %20 = vector.broadcast %c32_i32 : i32 to vector<1x128xi32>
    %21 = arith.cmpi slt, %19, %20 : vector<1x128xi32>
    %c0_i32 = arith.constant 0 : i32
    %c0_11 = arith.constant 0 : index
    %c0_12 = arith.constant 0 : index
    %22 = vector.load %arg10[%c0_11, %c0_12] : memref<16x128xf32, #tpu.memory_space<vmem>>, vector<16x128xf32>
    %23 = arith.index_cast %c0_i32 : i32 to index
    %c0_13 = arith.constant 0 : index
    %c0_14 = arith.constant 0 : index
    %24 = vector.load %arg6[%23, %c0_13, %c0_14] : memref<2x128x128xbf16, #tpu.memory_space<vmem>>, vector<1x128x128xbf16>
    %25 = vector.shape_cast %24 : vector<1x128x128xbf16> to vector<128x128xbf16>
    %26 = arith.index_cast %c0_i32 : i32 to index
    %c0_15 = arith.constant 0 : index
    %c0_16 = arith.constant 0 : index
    %27 = vector.load %arg7[%26, %c0_15, %c0_16] : memref<2x8x128xf32, #tpu.memory_space<vmem>>, vector<1x8x128xf32>
    %28 = vector.shape_cast %27 : vector<1x8x128xf32> to vector<8x128xf32>
    %29 = vector.extract_strided_slice %28 {offsets = [0, 0], sizes = [1, 128], strides = [1, 1]} : vector<8x128xf32> to vector<1x128xf32>
    %30 = vector.extract_strided_slice %28 {offsets = [1, 0], sizes = [1, 128], strides = [1, 1]} : vector<8x128xf32> to vector<1x128xf32>
    %31 = vector.extract_strided_slice %28 {offsets = [2, 0], sizes = [1, 128], strides = [1, 1]} : vector<8x128xf32> to vector<1x128xf32>
    %c0_17 = arith.constant 0 : index
    %c0_18 = arith.constant 0 : index
    %32 = vector.load %arg5[%c0_17, %c0_18] : memref<16x16xbf16, #tpu.memory_space<vmem>>, vector<16x16xbf16>
    %33 = arith.truncf %22 : vector<16x128xf32> to vector<16x128xbf16>
    %cst_19 = arith.constant dense<0.000000e+00> : vector<16x128xf32>
    %34 = tpu.matmul %32, %33, %cst_19 {dimension_numbers = #tpu.dot_dimension_numbers<[1], [0], [0], [1], [0, 0, 1, 1], [], []>} : vector<16x16xbf16>, vector<16x128xbf16>, vector<16x128xf32> -> vector<16x128xf32>
    %35 = arith.truncf %34 : vector<16x128xf32> to vector<16x128xbf16>
    %cst_20 = arith.constant dense<0.000000e+00> : vector<16x128xf32>
    %36 = tpu.matmul %35, %25, %cst_20 {dimension_numbers = #tpu.dot_dimension_numbers<[1], [0], [0], [1], [0, 0, 1, 1], [], []>} : vector<16x128xbf16>, vector<128x128xbf16>, vector<16x128xf32> -> vector<16x128xf32>
    %37 = vector.broadcast %29 : vector<1x128xf32> to vector<16x128xf32>
    %38 = arith.addf %36, %37 : vector<16x128xf32>
    %cst_21 = arith.constant 0.000000e+00 : f32
    %39 = vector.broadcast %cst_21 : f32 to vector<16x128xf32>
    %40 = arith.maximumf %38, %39 : vector<16x128xf32>
    %41 = arith.addf %22, %40 : vector<16x128xf32>
    %cst_22 = arith.constant dense<0.000000e+00> : vector<16xf32>
    %42 = vector.multi_reduction <add>, %41, %cst_22 [1] : vector<16x128xf32> to vector<16xf32>
    %43 = vector.shape_cast %42 : vector<16xf32> to vector<16x1xf32>
    %cst_23 = arith.constant 3.125000e-02 : f32
    %44 = vector.broadcast %cst_23 : f32 to vector<16x1xf32>
    %45 = arith.mulf %43, %44 : vector<16x1xf32>
    %46 = vector.broadcast %45 : vector<16x1xf32> to vector<16x128xf32>
    %47 = arith.subf %41, %46 : vector<16x128xf32>
    %cst_24 = arith.constant 0.000000e+00 : f32
    %48 = vector.shape_cast %21 : vector<1x128xi1> to vector<1x128xi1>
    %49 = vector.broadcast %48 : vector<1x128xi1> to vector<16x128xi1>
    %50 = vector.broadcast %cst_24 : f32 to vector<16x128xf32>
    %51 = arith.select %49, %47, %50 : vector<16x128xi1>, vector<16x128xf32>
    %52 = arith.mulf %51, %51 : vector<16x128xf32>
    %cst_25 = arith.constant dense<0.000000e+00> : vector<16xf32>
    %53 = vector.multi_reduction <add>, %52, %cst_25 [1] : vector<16x128xf32> to vector<16xf32>
    %54 = vector.shape_cast %53 : vector<16xf32> to vector<16x1xf32>
    %cst_26 = arith.constant 3.125000e-02 : f32
    %55 = vector.broadcast %cst_26 : f32 to vector<16x1xf32>
    %56 = arith.mulf %54, %55 : vector<16x1xf32>
    %cst_27 = arith.constant 9.99999974E-6 : f32
    %57 = vector.broadcast %cst_27 : f32 to vector<16x1xf32>
    %58 = arith.addf %56, %57 : vector<16x1xf32>
    %59 = math.rsqrt %58 : vector<16x1xf32>
    %60 = vector.broadcast %59 : vector<16x1xf32> to vector<16x128xf32>
    %61 = arith.mulf %51, %60 : vector<16x128xf32>
    %62 = vector.broadcast %30 : vector<1x128xf32> to vector<16x128xf32>
    %63 = arith.mulf %61, %62 : vector<16x128xf32>
    %64 = vector.broadcast %31 : vector<1x128xf32> to vector<16x128xf32>
    %65 = arith.addf %63, %64 : vector<16x128xf32>
    %c0_28 = arith.constant 0 : index
    %c0_29 = arith.constant 0 : index
    %66 = vector.load %arg10[%c0_28, %c0_29] : memref<16x128xf32, #tpu.memory_space<vmem>>, vector<16x128xf32>
    tpu.vector_store %arg10[%c0_28, %c0_29], %65 {strides = array<i32>} : memref<16x128xf32, #tpu.memory_space<vmem>>, vector<16x128xf32>,
    %c1_i32 = arith.constant 1 : i32
    %c0_30 = arith.constant 0 : index
    %c0_31 = arith.constant 0 : index
    %67 = vector.load %arg10[%c0_30, %c0_31] : memref<16x128xf32, #tpu.memory_space<vmem>>, vector<16x128xf32>
    %68 = arith.index_cast %c1_i32 : i32 to index
    %c0_32 = arith.constant 0 : index
    %c0_33 = arith.constant 0 : index
    %69 = vector.load %arg6[%68, %c0_32, %c0_33] : memref<2x128x128xbf16, #tpu.memory_space<vmem>>, vector<1x128x128xbf16>
    %70 = vector.shape_cast %69 : vector<1x128x128xbf16> to vector<128x128xbf16>
    %71 = arith.index_cast %c1_i32 : i32 to index
    %c0_34 = arith.constant 0 : index
    %c0_35 = arith.constant 0 : index
    %72 = vector.load %arg7[%71, %c0_34, %c0_35] : memref<2x8x128xf32, #tpu.memory_space<vmem>>, vector<1x8x128xf32>
    %73 = vector.shape_cast %72 : vector<1x8x128xf32> to vector<8x128xf32>
    %74 = vector.extract_strided_slice %73 {offsets = [0, 0], sizes = [1, 128], strides = [1, 1]} : vector<8x128xf32> to vector<1x128xf32>
    %75 = vector.extract_strided_slice %73 {offsets = [1, 0], sizes = [1, 128], strides = [1, 1]} : vector<8x128xf32> to vector<1x128xf32>
    %76 = vector.extract_strided_slice %73 {offsets = [2, 0], sizes = [1, 128], strides = [1, 1]} : vector<8x128xf32> to vector<1x128xf32>
    %c0_36 = arith.constant 0 : index
    %c0_37 = arith.constant 0 : index
    %77 = vector.load %arg5[%c0_36, %c0_37] : memref<16x16xbf16, #tpu.memory_space<vmem>>, vector<16x16xbf16>
    %78 = arith.truncf %67 : vector<16x128xf32> to vector<16x128xbf16>
    %cst_38 = arith.constant dense<0.000000e+00> : vector<16x128xf32>
    %79 = tpu.matmul %77, %78, %cst_38 {dimension_numbers = #tpu.dot_dimension_numbers<[1], [0], [0], [1], [0, 0, 1, 1], [], []>} : vector<16x16xbf16>, vector<16x128xbf16>, vector<16x128xf32> -> vector<16x128xf32>
    %80 = arith.truncf %79 : vector<16x128xf32> to vector<16x128xbf16>
    %cst_39 = arith.constant dense<0.000000e+00> : vector<16x128xf32>
    %81 = tpu.matmul %80, %70, %cst_39 {dimension_numbers = #tpu.dot_dimension_numbers<[1], [0], [0], [1], [0, 0, 1, 1], [], []>} : vector<16x128xbf16>, vector<128x128xbf16>, vector<16x128xf32> -> vector<16x128xf32>
    %82 = vector.broadcast %74 : vector<1x128xf32> to vector<16x128xf32>
    %83 = arith.addf %81, %82 : vector<16x128xf32>
    %cst_40 = arith.constant 0.000000e+00 : f32
    %84 = vector.broadcast %cst_40 : f32 to vector<16x128xf32>
    %85 = arith.maximumf %83, %84 : vector<16x128xf32>
    %86 = arith.addf %67, %85 : vector<16x128xf32>
    %cst_41 = arith.constant dense<0.000000e+00> : vector<16xf32>
    %87 = vector.multi_reduction <add>, %86, %cst_41 [1] : vector<16x128xf32> to vector<16xf32>
    %88 = vector.shape_cast %87 : vector<16xf32> to vector<16x1xf32>
    %cst_42 = arith.constant 3.125000e-02 : f32
    %89 = vector.broadcast %cst_42 : f32 to vector<16x1xf32>
    %90 = arith.mulf %88, %89 : vector<16x1xf32>
    %91 = vector.broadcast %90 : vector<16x1xf32> to vector<16x128xf32>
    %92 = arith.subf %86, %91 : vector<16x128xf32>
    %cst_43 = arith.constant 0.000000e+00 : f32
    %93 = vector.shape_cast %21 : vector<1x128xi1> to vector<1x128xi1>
    %94 = vector.broadcast %93 : vector<1x128xi1> to vector<16x128xi1>
    %95 = vector.broadcast %cst_43 : f32 to vector<16x128xf32>
    %96 = arith.select %94, %92, %95 : vector<16x128xi1>, vector<16x128xf32>
    %97 = arith.mulf %96, %96 : vector<16x128xf32>
    %cst_44 = arith.constant dense<0.000000e+00> : vector<16xf32>
    %98 = vector.multi_reduction <add>, %97, %cst_44 [1] : vector<16x128xf32> to vector<16xf32>
    %99 = vector.shape_cast %98 : vector<16xf32> to vector<16x1xf32>
    %cst_45 = arith.constant 3.125000e-02 : f32
    %100 = vector.broadcast %cst_45 : f32 to vector<16x1xf32>
    %101 = arith.mulf %99, %100 : vector<16x1xf32>
    %cst_46 = arith.constant 9.99999974E-6 : f32
    %102 = vector.broadcast %cst_46 : f32 to vector<16x1xf32>
    %103 = arith.addf %101, %102 : vector<16x1xf32>
    %104 = math.rsqrt %103 : vector<16x1xf32>
    %105 = vector.broadcast %104 : vector<16x1xf32> to vector<16x128xf32>
    %106 = arith.mulf %96, %105 : vector<16x128xf32>
    %107 = vector.broadcast %75 : vector<1x128xf32> to vector<16x128xf32>
    %108 = arith.mulf %106, %107 : vector<16x128xf32>
    %109 = vector.broadcast %76 : vector<1x128xf32> to vector<16x128xf32>
    %110 = arith.addf %108, %109 : vector<16x128xf32>
    %c0_47 = arith.constant 0 : index
    %c0_48 = arith.constant 0 : index
    %111 = vector.load %arg10[%c0_47, %c0_48] : memref<16x128xf32, #tpu.memory_space<vmem>>, vector<16x128xf32>
    tpu.vector_store %arg10[%c0_47, %c0_48], %110 {strides = array<i32>} : memref<16x128xf32, #tpu.memory_space<vmem>>, vector<16x128xf32>,
    %c2_i32 = arith.constant 2 : i32
    %112 = tpu.iota {dimensions = array<i32: 1>} : vector<8x16xi32>
    %c0_49 = arith.constant 0 : index
    %c0_50 = arith.constant 0 : index
    %113 = vector.load %arg2[%c0_49, %c0_50] : memref<8x1xi32, #tpu.memory_space<vmem>>, vector<8x1xi32>
    %114 = vector.broadcast %113 : vector<8x1xi32> to vector<8x16xi32>
    %115 = arith.cmpi eq, %114, %112 : vector<8x16xi32>
    %116 = arith.extui %115 : vector<8x16xi1> to vector<8x16xi32>
    %117 = arith.sitofp %116 : vector<8x16xi32> to vector<8x16xf32>
    %118 = arith.truncf %117 : vector<8x16xf32> to vector<8x16xbf16>
    %c0_51 = arith.constant 0 : index
    %c0_52 = arith.constant 0 : index
    %119 = vector.load %arg10[%c0_51, %c0_52] : memref<16x128xf32, #tpu.memory_space<vmem>>, vector<16x128xf32>
    %120 = arith.truncf %119 : vector<16x128xf32> to vector<16x128xbf16>
    %cst_53 = arith.constant dense<0.000000e+00> : vector<8x128xf32>
    %121 = tpu.matmul %118, %120, %cst_53 {dimension_numbers = #tpu.dot_dimension_numbers<[1], [0], [0], [1], [0, 0, 1, 1], [], []>} : vector<8x16xbf16>, vector<16x128xbf16>, vector<8x128xf32> -> vector<8x128xf32>
    %122 = arith.truncf %121 : vector<8x128xf32> to vector<8x128xbf16>
    %c0_54 = arith.constant 0 : index
    %c0_55 = arith.constant 0 : index
    %123 = vector.load %arg8[%c0_54, %c0_55] : memref<128x128xbf16, #tpu.memory_space<vmem>>, vector<128x128xbf16>
    %cst_56 = arith.constant dense<0.000000e+00> : vector<8x128xf32>
    %124 = tpu.matmul %122, %123, %cst_56 {dimension_numbers = #tpu.dot_dimension_numbers<[1], [0], [0], [1], [0, 0, 1, 1], [], []>} : vector<8x128xbf16>, vector<128x128xbf16>, vector<8x128xf32> -> vector<8x128xf32>
    %c0_57 = arith.constant 0 : index
    %c0_58 = arith.constant 0 : index
    %125 = vector.load %arg9[%c0_57, %c0_58] : memref<8x128xf32, #tpu.memory_space<vmem>>, vector<8x128xf32>
    tpu.vector_store %arg9[%c0_57, %c0_58], %124 {strides = array<i32>} : memref<8x128xf32, #tpu.memory_space<vmem>>, vector<8x128xf32>,
    return
  }
}

</mosaic_0001>

<bundles_post_ra>
// kernel: tpu_custom_call.1
= control target key start
LH: loop header
LB: loop body
LE: loop exit
PB: predicated region body
PF: predicated region fallthrough
CT: control target
= control target key end

     0   :  { %14 = vsyncpa [#allocation4], 0  ;;  %s1652_s0 = inlined_call_operand.vmem [shape: s32[16,1], index: 0, kind: input, shape index: {}]   ;;  %s1653_s1 = inlined_call_operand.vmem [shape: s32[16,1], index: 1, kind: input, shape index: {}]   ;;  %s1654_s2 = inlined_call_operand.vmem [shape: s32[8,1], index: 2, kind: input, shape index: {}]   ;;  %s1655_s3 = inlined_call_operand.hbm [shape: f32[128,128], index: 3, kind: input, shape index: {}]   ;;  %s1656_s4 = inlined_call_operand.hbm [shape: f32[128,128], index: 4, kind: input, shape index: {}]   ;;  %s1657_s5 = inlined_call_operand.vmem [shape: bf16[16,16], index: 5, kind: input, shape index: {}]   ;;  %s1658_s6 = inlined_call_operand.hbm [shape: bf16[2,128,128], index: 6, kind: input, shape index: {}]   ;;  %s1659_s7 = inlined_call_operand.hbm [shape: f32[2,8,128], index: 7, kind: input, shape index: {}]   ;;  %s1660_s8 = inlined_call_operand.vmem [shape: bf16[128,128], index: 8, kind: input, shape index: {}]   ;;  %s1661_s9 = inlined_call_operand.hbm [shape: f32[8,128], index: 9, kind: output, shape index: {}]  }
   0x1   :  { %15 = vsyncpa [#allocation7], 0 }
   0x2   :  { %16 = vsyncpa [#allocation10], 0 }
   0x3   :  { %17 = vsyncpa [#allocation5], 0  ;;  %s1390_s30 = smov [#allocation6]   ;;  %s1391_s11 = smov [#allocation3]  }
   0x4   :  { %s41_s10 = sshll.u32 %s1390_s30, 4  ;;  %s29_s12 = sshll.u32 %s1391_s11, 4  ;;  %s42_s10 = int_to_ptr.vmem [resolvable:$true] %s41_s10  ;;  %s1453_s12 = int_to_ptr.vmem [resolvable:$true] %s29_s12 }
   0x5   :  { %s1272_s15 = scalar_lea.hbm %s1656_s4, 2048 }
   0x6   :  { %p1273_p0 = scmp.ne.s32.totalorder %s1656_s4, %s1272_s15  ;;  %p1276_p1 = scmp.lt.u32.totalorder %s1272_s15, %s1656_s4 }
   0x8   :  { %p1278_p2 = pnand %p1276_p1, %p1273_p0 }
   0xa   :  { %1281 = shalt.err (!%p1278_p2)
}
   0xb   :  { %s1282_s20 = scalar_lea.vmem %s42_s10, 2048  ;;  %p1287_p4 = scmp.lt.s32.totalorder %s42_s10, %s42_s10 }
   0xc   :  { %p1283_p3 = scmp.ne.s32.totalorder %s42_s10, %s1282_s20  ;;  %p1288_p5 = scmp.lt.s32.totalorder %s1282_s20, %s1282_s20 }
   0xe   :  { %p1289_p6 = por %p1288_p5, %p1287_p4 }
  0x10   :  { %p1290_p7 = pnand %p1289_p6, %p1283_p3 }
  0x12   :  { %1293 = shalt.err (!%p1290_p7)
}
  0x13   :  { %s1392_s21 = smov 128   ;;  %s1393_s22 = smov 8  }
  0x14   :  { %47 = dma.hbm_to_vmem [thread:$0]  %s1656_s4, 2048, %s42_s10, [#allocation7], %s1392_s21, %s1392_s21, %s1393_s22  }
  0x15   :  { %s1294_s27 = scalar_lea.hbm %s1655_s3, 2048 }
  0x16   :  { %p1295_p8 = scmp.ne.s32.totalorder %s1655_s3, %s1294_s27  ;;  %p1298_p9 = scmp.lt.u32.totalorder %s1294_s27, %s1655_s3 }
  0x18   :  { %p1300_p10 = pnand %p1298_p9, %p1295_p8 }
  0x1a   :  { %1303 = shalt.err (!%p1300_p10)
}
  0x1b   :  { %s1304_s13 = scalar_lea.vmem %s1453_s12, 2048  ;;  %p1309_p12 = scmp.lt.s32.totalorder %s1453_s12, %s1453_s12 }
  0x1c   :  { %p1305_p11 = scmp.ne.s32.totalorder %s1453_s12, %s1304_s13  ;;  %p1310_p13 = scmp.lt.s32.totalorder %s1304_s13, %s1304_s13 }
  0x1e   :  { %p1311_p0 = por %p1310_p13, %p1309_p12 }
  0x20   :  { %p1312_p1 = pnand %p1311_p0, %p1305_p11 }
  0x22   :  { %1315 = shalt.err (!%p1312_p1)
}
  0x23   :  { %35 = dma.hbm_to_vmem [thread:$0]  %s1655_s3, 2048, %s1453_s12, [#allocation4], %s1392_s21, %s1392_s21, %s1393_s22  }
  0x24   :  { %s1394_s14 = smov [#allocation8]   ;;  %s1316_s18 = scalar_lea.hbm %s1658_s6, 2048 }
  0x25   :  { %s55_s15 = sshll.u32 %s1394_s14, 4  ;;  %p1317_p2 = scmp.ne.s32.totalorder %s1658_s6, %s1316_s18  ;;  %s56_s15 = int_to_ptr.vmem [resolvable:$true] %s55_s15 }
  0x26   :  { %p1320_p3 = scmp.lt.u32.totalorder %s1316_s18, %s1658_s6 }
  0x28   :  { %p1322_p4 = pnand %p1320_p3, %p1317_p2 }
  0x2a   :  { %1325 = shalt.err (!%p1322_p4)
}
  0x2b   :  { %s1326_s25 = scalar_lea.vmem %s56_s15, 2048  ;;  %p1331_p6 = scmp.lt.s32.totalorder %s56_s15, %s56_s15 }
  0x2c   :  { %p1327_p5 = scmp.ne.s32.totalorder %s56_s15, %s1326_s25  ;;  %p1332_p7 = scmp.lt.s32.totalorder %s1326_s25, %s1326_s25 }
  0x2e   :  { %p1333_p8 = por %p1332_p7, %p1331_p6 }
  0x30   :  { %p1334_p9 = pnand %p1333_p8, %p1327_p5 }
  0x32   :  { %1337 = shalt.err (!%p1334_p9)
}
  0x33   :  { %s1395_s3 = smov 64   ;;  %s1396_s12 = smov 4  }
  0x34   :  { %61 = dma.hbm_to_vmem [thread:$0]  %s1658_s6, 2048, %s56_s15, [#allocation7], %s1395_s3, %s1395_s3, %s1396_s12  }
  0x35   :  { %s1397_s28 = smov [#allocation9]   ;;  %s1338_s13 = scalar_lea.hbm %s1659_s7, 256 }
  0x36   :  { %s67_s29 = sshll.u32 %s1397_s28, 4  ;;  %p1339_p10 = scmp.ne.s32.totalorder %s1659_s7, %s1338_s13  ;;  %s68_s29 = int_to_ptr.vmem [resolvable:$true] %s67_s29 }
  0x37   :  { %p1342_p11 = scmp.lt.u32.totalorder %s1338_s13, %s1659_s7 }
  0x39   :  { %p1344_p12 = pnand %p1342_p11, %p1339_p10 }
  0x3b   :  { %1347 = shalt.err (!%p1344_p12)
}
  0x3c   :  { %s1348_s17 = scalar_lea.vmem %s68_s29, 256  ;;  %p1353_p0 = scmp.lt.s32.totalorder %s68_s29, %s68_s29 }
  0x3d   :  { %p1349_p13 = scmp.ne.s32.totalorder %s68_s29, %s1348_s17  ;;  %p1354_p1 = scmp.lt.s32.totalorder %s1348_s17, %s1348_s17 }
  0x3f   :  { %p1355_p2 = por %p1354_p1, %p1353_p0 }
  0x41   :  { %p1356_p3 = pnand %p1355_p2, %p1349_p13 }
  0x43   :  { %1359 = shalt.err (!%p1356_p3)
}
  0x44   :  { %73 = dma.hbm_to_vmem [thread:$0]  %s1659_s7, 256, %s68_s29, [#allocation10], %s1392_s21, %s1392_s21, %s1393_s22  }
  0x45   :  { %1382 = dma.done.wait [#allocation4], 2048  }
  0x46   :  { %1383 = vsyncadd [#allocation4], 4294965248 }
  0x47   :  { %1384 = dma.done.wait [#allocation7], 4096  }
  0x48   :  { %1385 = vsyncadd [#allocation7], 4294963200 }
  0x49   :  { %1386 = dma.done.wait [#allocation10], 256  }
  0x4a   :  { %1387 = vsyncadd [#allocation10], 4294967040  ;;  %v1398_v0 = vmov 0   ;;  %v105_v1 = vld [vmem:[%s1653_s1] sm:$0xff]  ;;  %v106_v3 = vld [vmem:[%s1653_s1 + $0x8] sm:$0xff]  ;;  %v89_v32 = vlaneseq  ;;  %v1399_v37 = vmov 1.0  }
  0x4b   :  { %1236 = vset.pattern.permute.xlu0 %v1398_v0  ;;  %1237 = vset.pattern.permute.xlu1 %v1398_v0  ;;  %v91_v2 = vld [vmem:[%s1652_s0] sm:$0xff]  ;;  %v136_v5 = vld [vmem:[#allocation6 + $0x8] sm:$0xff]  ;;  %v137_v8 = vld [vmem:[#allocation6 + $0x10] sm:$0xff]  ;;  %v1400_v60 = vmov 0.0   ;;  %vm1401_vm4 = vmmov 0   ;;  %vm333_vm5 = vcmask 130048  }
  0x4c   :  { %108 = vperm.xlu0 %1236, %v105_v1   ;;  %94 = vperm.xlu1 %1237, %v91_v2   ;;  %v135_v4 = vld [vmem:[#allocation6] sm:$0xff]  ;;  %v92_v6 = vld [vmem:[%s1652_s0 + $0x8] sm:$0xff]  ;;  %v138_v9 = vld [vmem:[#allocation6 + $0x18] sm:$0xff]  ;;  %v1530_v33 = vand.u32 127, %v89_v32  ;;  %s1402_s19 = smov [#allocation11]  }
  0x4d   :  { %v1157_v7 = vpack.c.bf16 %v136_v5, %v135_v4  ;;  %v1161_v10 = vpack.c.bf16 %v138_v9, %v137_v8  ;;  %v139_v11 = vld [vmem:[#allocation6 + $0x20] sm:$0xff]  ;;  %v140_v12 = vld [vmem:[#allocation6 + $0x28] sm:$0xff]  ;;  %v141_v14 = vld [vmem:[#allocation6 + $0x30] sm:$0xff]  ;;  %1079 = vmatprep.subr.bf16.mxu1 %v1400_v60  ;;  %1081 = vmatprep.mubr.msk.bf16.mxu1 %vm1401_vm4, %v1400_v60  ;;  %s891_s20 = sshll.u32 %s1402_s19, 4  ;;  %s892_s20 = int_to_ptr.vmem [resolvable:$true] %s891_s20 }
  0x4e   :  { %v1165_v13 = vpack.c.bf16 %v140_v12, %v139_v11  ;;  %v142_v15 = vld [vmem:[#allocation6 + $0x38] sm:$0xff]  ;;  %v143_v17 = vld [vmem:[#allocation6 + $0x40] sm:$0xff]  ;;  %v144_v18 = vld [vmem:[#allocation6 + $0x48] sm:$0xff]  ;;  %vm305_vm6 = vcmp.lt.s32.totalorder %v1530_v33, 32  ;;  %s1360_s23 = scalar_lea.vmem %s892_s20, 128  ;;  %p1365_p5 = scmp.lt.s32.totalorder %s892_s20, %s892_s20 }
  0x4f   :  { %1158 = vmatprep.subr.bf16.mxu0 %v1157_v7  ;;  %v1169_v16 = vpack.c.bf16 %v142_v15, %v141_v14  ;;  %v1173_v19 = vpack.c.bf16 %v144_v18, %v143_v17  ;;  %v145_v20 = vld [vmem:[#allocation6 + $0x50] sm:$0xff]  ;;  %v146_v21 = vld [vmem:[#allocation6 + $0x58] sm:$0xff]  ;;  %v147_v23 = vld [vmem:[#allocation6 + $0x60] sm:$0xff]  ;;  %p1361_p4 = scmp.ne.s32.totalorder %s892_s20, %s1360_s23  ;;  %p1366_p6 = scmp.lt.s32.totalorder %s1360_s23, %s1360_s23 }
  0x50   :  { %111 = vperm.xlu0 %1236, %v106_v3   ;;  %97 = vperm.xlu1 %1237, %v92_v6   ;;  %v1177_v22 = vpack.c.bf16 %v146_v21, %v145_v20  ;;  %v148_v24 = vld [vmem:[#allocation6 + $0x68] sm:$0xff]  ;;  %v149_v26 = vld [vmem:[#allocation6 + $0x70] sm:$0xff]  ;;  %v150_v27 = vld [vmem:[#allocation6 + $0x78] sm:$0xff] }
  0x51   :  { %1160 = vmatpush3.bf16.msra.mxu0 %v1157_v7  ;;  %v1181_v25 = vpack.c.bf16 %v148_v24, %v147_v23  ;;  %v1185_v28 = vpack.c.bf16 %v150_v27, %v149_v26  ;;  %v119_v29 = vld [vmem:[#allocation3] sm:$0xff]  ;;  %v120_v30 = vld [vmem:[#allocation3 + $0x8] sm:$0xff]  ;;  %v121_v35 = vld [vmem:[#allocation3 + $0x10] sm:$0xff]  ;;  %p1367_p7 = por %p1366_p6, %p1365_p5 }
  0x52   :  { %1162 = vmatprep.subr.bf16.mxu0 %v1161_v10  ;;  %v1189_v31 = vpack.c.bf16 %v120_v30, %v119_v29  ;;  %v122_v36 = vld [vmem:[#allocation3 + $0x18] sm:$0xff]  ;;  %v123_v41 = vld [vmem:[#allocation3 + $0x20] sm:$0xff]  ;;  %v124_v42 = vld [vmem:[#allocation3 + $0x28] sm:$0xff] }
  0x53   :  { %v1193_v40 = vpack.c.bf16 %v122_v36, %v121_v35  ;;  %v1197_v43 = vpack.c.bf16 %v124_v42, %v123_v41  ;;  %v125_v44 = vld [vmem:[#allocation3 + $0x30] sm:$0xff]  ;;  %v126_v45 = vld [vmem:[#allocation3 + $0x38] sm:$0xff]  ;;  %v127_v47 = vld [vmem:[#allocation3 + $0x40] sm:$0xff]  ;;  %p1368_p8 = pnand %p1367_p7, %p1361_p4 }
  0x54   :  { %v1201_v46 = vpack.c.bf16 %v126_v45, %v125_v44  ;;  %v128_v48 = vld [vmem:[#allocation3 + $0x48] sm:$0xff]  ;;  %v129_v50 = vld [vmem:[#allocation3 + $0x50] sm:$0xff]  ;;  %v130_v51 = vld [vmem:[#allocation3 + $0x58] sm:$0xff] }
  0x55   :  { %1164 = vmatpush3.bf16.msra.mxu0 %v1161_v10  ;;  %v1205_v49 = vpack.c.bf16 %v128_v48, %v127_v47  ;;  %v1209_v52 = vpack.c.bf16 %v130_v51, %v129_v50  ;;  %v131_v53 = vld [vmem:[#allocation3 + $0x60] sm:$0xff]  ;;  %v132_v54 = vld [vmem:[#allocation3 + $0x68] sm:$0xff]  ;;  %v133_v56 = vld [vmem:[#allocation3 + $0x70] sm:$0xff] }
  0x56   :  { %1166 = vmatprep.subr.bf16.mxu0 %v1165_v13  ;;  %v1213_v55 = vpack.c.bf16 %v132_v54, %v131_v53  ;;  %v134_v57 = vld [vmem:[#allocation3 + $0x78] sm:$0xff]  ;;  %v1238_v2 = vld [vmem:[%s1657_s5] sm:$0xff]   ;;  %v1240_v4 = vld [vmem:[#allocation8 + $0x8] sm:$0xff]  }
  0x57   :  { %v1217_v58 = vpack.c.bf16 %v134_v57, %v133_v56  ;;  %v1239_v3 = vld [vmem:[#allocation8] sm:$0xff]   ;;  %v1241_v5 = vld [vmem:[#allocation8 + $0x10] sm:$0xff]   ;;  %v1242_v6 = vld [vmem:[#allocation8 + $0x18] sm:$0xff]  }
  0x58   :  { %v1243_v7 = vld [vmem:[#allocation8 + $0x20] sm:$0xff]   ;;  %v1244_v8 = vld [vmem:[#allocation8 + $0x28] sm:$0xff]   ;;  %v1245_v9 = vld [vmem:[#allocation8 + $0x30] sm:$0xff]  }
  0x59   :  { %1168 = vmatpush3.bf16.msra.mxu0 %v1165_v13  ;;  %v1246_v10 = vld [vmem:[#allocation8 + $0x38] sm:$0xff]   ;;  %v324_v18 = vld [vmem:[#allocation9] sm:$0xff] }
  0x5a   :  { %1170 = vmatprep.subr.bf16.mxu0 %v1169_v16 }
  0x5d   :  { %1172 = vmatpush3.bf16.msra.mxu0 %v1169_v16  ;;  %v1560_v16 = vshrl.u32 %v89_v32, 7 }
  0x5e   :  { %1174 = vmatprep.subr.bf16.mxu0 %v1173_v19 }
  0x5f   :  { %v381_v17 = vsub.s32 0, %v1560_v16  ;;  %v504_v47 = vsub.s32 1, %v1560_v16  ;;  %v510_v50 = vsub.s32 2, %v1560_v16  ;;  %v1263_v16 = vld [vmem:[%s1660_s8 + $0x38] sm:$0xff]  }
  0x61   :  { %1176 = vmatpush3.bf16.msra.mxu0 %v1173_v19  ;;  %v382_v19 = vrot.slane %v324_v18, %v381_v17  ;;  %v511_v53 = vrot.slane %v324_v18, %v510_v50 }
  0x62   :  { %1178 = vmatprep.subr.bf16.mxu0 %v1177_v22 }
  0x65   :  { %1180 = vmatpush3.bf16.msra.mxu0 %v1177_v22 }
  0x66   :  { %1182 = vmatprep.subr.bf16.mxu0 %v1181_v25 }
  0x69   :  { %1184 = vmatpush3.bf16.msra.mxu0 %v1181_v25 }
  0x6a   :  { %1186 = vmatprep.subr.bf16.mxu0 %v1185_v28 }
  0x6d   :  { %1188 = vmatpush3.bf16.msra.mxu0 %v1185_v28 }
  0x6e   :  { %1190 = vmatprep.subr.bf16.mxu0 %v1189_v31 }
  0xcb   :  { %v109_v34 = vpop.permute.xlu0 %108  ;;  %v95_v38 = vpop.permute.xlu1 %94 }
  0xcc   :  { %vm113_vm0 = vcmp.eq.s32.totalorder %v109_v34, %v1530_v33  ;;  %vm99_vm1 = vcmp.eq.s32.totalorder %v95_v38, %v1530_v33 }
  0xcd   :  { %1041 = vmatprep.mubr.msk.f32.mxu0 %vm113_vm0, %v1399_v37 }
  0xcf   :  { %v112_v39 = vpop.permute.xlu0 %111  ;;  %v98_v59 = vpop.permute.xlu1 %97 }
  0xd0   :  { %vm114_vm2 = vcmp.eq.s32.totalorder %v112_v39, %v1530_v33  ;;  %vm100_vm3 = vcmp.eq.s32.totalorder %v98_v59, %v1530_v33 }
  0xd1   :  { %1042 = vmatmul.mubr.msk.f32.vlgmr.msra.gmra.mrb[0].mxu0 %vm114_vm2, %v1399_v37 }
  0xd2   :  { %1192 = vmatpush3.bf16.msra.mxu0 %v1189_v31  ;;  %1076 = vmatprep.mubr.msk.f32.mxu0 %vm99_vm1, %v1399_v37 }
  0xd3   :  { %1194 = vmatprep.subr.bf16.mxu0 %v1193_v40 }
  0xd6   :  { %1196 = vmatpush3.bf16.msra.mxu0 %v1193_v40 }
  0xd7   :  { %1198 = vmatprep.subr.bf16.mxu0 %v1197_v43 }
  0xda   :  { %1200 = vmatpush3.bf16.msra.mxu0 %v1197_v43 }
  0xdb   :  { %1202 = vmatprep.subr.bf16.mxu0 %v1201_v46 }
  0xde   :  { %1204 = vmatpush3.bf16.msra.mxu0 %v1201_v46 }
  0xdf   :  { %1206 = vmatprep.subr.bf16.mxu0 %v1205_v49 }
  0xe2   :  { %1208 = vmatpush3.bf16.msra.mxu0 %v1205_v49  ;;  %v505_v49 = vrot.slane %v324_v18, %v504_v47 }
  0xe3   :  { %1210 = vmatprep.subr.bf16.mxu0 %v1209_v52 }
  0xe6   :  { %1212 = vmatpush3.bf16.msra.mxu0 %v1209_v52 }
  0xe7   :  { %1214 = vmatprep.subr.bf16.mxu0 %v1213_v55 }
  0xea   :  { %1216 = vmatpush3.bf16.msra.mxu0 %v1213_v55 }
  0xeb   :  { %1218 = vmatprep.subr.bf16.mxu0 %v1217_v58 }
  0xee   :  { %1220 = vmatpush3.bf16.msra.mxu0 %v1217_v58 }
  0xef   :  { %1137 = vmatprep.subr.bf16.mxu0 %v1400_v60 }
  0xf1   :  { %1077 = vmatmul.mubr.msk.f32.vlgmr.msra.gmra.mrb[0].mxu0 %vm100_vm3, %v1399_v37 }
  0xf2   :  { %1153 = vmatprep.mubr.msk.bf16.mxu0 %vm1401_vm4, %v1400_v60 }
 0x1c4   :  { %v1078_v61 = vpop.f32.mrb[0].mxu0 }
 0x1c5   :  { %v302_v62 = vmax.f32 %v1078_v61, 0.0  ;;  %v292_v63 = vpop.f32.mrb[1].mxu0  ;;  %v1247_v61 = vld [vmem:[%s1657_s5] sm:$0xff]  }
 0x1c6   :  { %v301_v0 = vmax.f32 %v292_v63, 0.0  ;;  %v1249_v63 = vld [vmem:[#allocation8 + $0x48] sm:$0xff]  }
 0x1c8   :  { %v327_v1 = vpack.c.bf16 %v302_v62, %v301_v0 }
 0x1ca   :  { %1080 = vmatpush3.bf16.msra.mxu1 %v327_v1  ;;  %v1251_v1 = vld [vmem:[#allocation8 + $0x58] sm:$0xff]  }
 0x1cb   :  { %1085 = vmatprep.subr.bf16.mxu1 %v1400_v60 }
 0x1cd   :  { %1082 = vmatmul.mubr.msk.bf16.vlgmr.msra.gmra.mrb[0].mxu1 %vm333_vm5, %v1238_v2  ;;  %v1252_v2 = vld [vmem:[#allocation8 + $0x60] sm:$0xff]  }
 0x1ce   :  { %1086 = vmatpush3.bf16.msra.mxu1 %v1239_v3  ;;  %1101 = vmatprep.mubr.msk.bf16.mxu1 %vm1401_vm4, %v1400_v60  ;;  %v1253_v3 = vld [vmem:[#allocation8 + $0x68] sm:$0xff]  }
 0x1cf   :  { %1087 = vmatprep.subr.bf16.mxu1 %v1400_v60 }
 0x1d2   :  { %1088 = vmatpush3.bf16.msra.mxu1 %v1240_v4  ;;  %v1254_v4 = vld [vmem:[#allocation8 + $0x70] sm:$0xff]  }
 0x1d3   :  { %1089 = vmatprep.subr.bf16.mxu1 %v1400_v60 }
 0x1d6   :  { %1090 = vmatpush3.bf16.msra.mxu1 %v1241_v5  ;;  %v1255_v5 = vld [vmem:[#allocation8 + $0x78] sm:$0xff]  }
 0x1d7   :  { %1091 = vmatprep.subr.bf16.mxu1 %v1400_v60 }
 0x1da   :  { %1092 = vmatpush3.bf16.msra.mxu1 %v1242_v6 }
 0x1db   :  { %1093 = vmatprep.subr.bf16.mxu1 %v1400_v60 }
 0x1de   :  { %1094 = vmatpush3.bf16.msra.mxu1 %v1243_v7 }
 0x1df   :  { %1095 = vmatprep.subr.bf16.mxu1 %v1400_v60 }
 0x1e2   :  { %1096 = vmatpush3.bf16.msra.mxu1 %v1244_v8 }
 0x1e3   :  { %1097 = vmatprep.subr.bf16.mxu1 %v1400_v60 }
 0x1e6   :  { %1098 = vmatpush3.bf16.msra.mxu1 %v1245_v9 }
 0x1e7   :  { %1099 = vmatprep.subr.bf16.mxu1 %v1400_v60 }
 0x1ea   :  { %1100 = vmatpush3.bf16.msra.mxu1 %v1246_v10 }
 0x1eb   :  { %1105 = vmatprep.subr.bf16.mxu1 %v1400_v60 }
 0x2a0   :  { %v371_v11 = vpop.f32.mrb[0].mxu1 }
 0x2a1   :  { %v1083_v12 = vpop.f32.mrb[1].mxu1 }
 0x2a2   :  { %v374_v13 = vpop.f32.mrb[2].mxu1 }
 0x2a3   :  { %v378_v14 = vpack.c.bf16 %v374_v13, %v371_v11  ;;  %v1084_v15 = vpop.f32.mrb[3].mxu1  ;;  %v536_v11 = vld [vmem:[#allocation9 + $0x8] sm:$0xff] }
 0x2a4   :  { %v593_v12 = vrot.slane %v536_v11, %v381_v17 }
 0x2a5   :  { %1102 = vmatmul.mubr.bf16.vlgmr.msra.gmra.mrb[4].mxu1 %v378_v14 }
 0x2a6   :  { %1107 = vmatprep.mubr.msk.bf16.mxu1 %vm1401_vm4, %v1400_v60 }
 0x378   :  { %v465_v20 = vpop.f32.mrb[4].mxu1 }
 0x379   :  { %v466_v21 = vadd.f32 %v465_v20, %v382_v19  ;;  %v1103_v22 = vpop.f32.mrb[5].mxu1 }
 0x37a   :  { %v468_v23 = vpop.f32.mrb[6].mxu1 }
 0x37b   :  { %v472_v24 = vmax.f32 %v466_v21, 0.0  ;;  %v469_v25 = vadd.f32 %v468_v23, %v382_v19  ;;  %v1104_v26 = vpop.f32.mrb[7].mxu1 }
 0x37d   :  { %v473_v27 = vmax.f32 %v469_v25, 0.0  ;;  %v474_v28 = vadd.f32 %v472_v24, %v301_v0  ;;  %v1250_v0 = vld [vmem:[#allocation8 + $0x50] sm:$0xff]  }
 0x37f   :  { %476 = vadd.xlane.f32.xlu0 %v474_v28  ;;  %v475_v29 = vadd.f32 %v473_v27, %v302_v62  ;;  %v1248_v62 = vld [vmem:[#allocation8 + $0x40] sm:$0xff]  }
 0x381   :  { %478 = vadd.xlane.f32.xlu1 %v475_v29 }
 0x40c   :  { %v477_v30 = vpop.xlane.xlu0 %476 }
 0x40d   :  { %v480_v31 = vmul.f32 0.03125, %v477_v30 }
 0x40e   :  { %v479_v32 = vpop.xlane.xlu1 %478 }
 0x40f   :  { %v482_v34 = vsub.f32 %v474_v28, %v480_v31  ;;  %v481_v35 = vmul.f32 0.03125, %v479_v32 }
 0x411   :  { %v483_v36 = vsub.f32 %v475_v29, %v481_v35  ;;  %v486_v37 = vsel %vm305_vm6, %v482_v34, 0.0  ;;  %v725_v35 = vld [vmem:[%s1654_s2] sm:$0xff] }
 0x412   :  { %v488_v38 = vmul.f32 %v486_v37, %v486_v37 }
 0x413   :  { %v487_v39 = vsel %vm305_vm6, %v483_v36, 0.0  ;;  %v1256_v36 = vld [vmem:[%s1660_s8] sm:$0xff]  }
 0x414   :  { %490 = vadd.xlane.f32.xlu0 %v488_v38  ;;  %v489_v40 = vmul.f32 %v487_v39, %v487_v39  ;;  %1138 = vmatpush3.bf16.msra.mxu0 %v1256_v36  ;;  %v1258_v38 = vld [vmem:[%s1660_s8 + $0x10] sm:$0xff]  }
 0x415   :  { %1139 = vmatprep.subr.bf16.mxu0 %v1400_v60 }
 0x418   :  { %492 = vadd.xlane.f32.xlu0 %v489_v40  ;;  %v1260_v40 = vld [vmem:[%s1660_s8 + $0x20] sm:$0xff]  }
 0x4a1   :  { %v491_v41 = vpop.xlane.xlu0 %490 }
 0x4a2   :  { %v494_v42 = vmul.f32 0.03125, %v491_v41  ;;  %v1261_v41 = vld [vmem:[%s1660_s8 + $0x28] sm:$0xff]  }
 0x4a4   :  { %v496_v43 = vadd.f32 1e-05, %v494_v42  ;;  %v1262_v42 = vld [vmem:[%s1660_s8 + $0x30] sm:$0xff]  }
 0x4a5   :  { %v493_v44 = vpop.xlane.xlu0 %492 }
 0x4a6   :  { %1264 = vrsqrt.f32 %v496_v43  ;;  %v495_v45 = vmul.f32 0.03125, %v493_v44 }
 0x4a8   :  { %v497_v46 = vadd.f32 1e-05, %v495_v45 }
 0x4aa   :  { %1266 = vrsqrt.f32 %v497_v46 }
 0x4b0   :  { %v1265_v48 = vpop.eup %1264 }
 0x4b1   :  { %v500_v51 = vmul.f32 %v1265_v48, %v486_v37  ;;  %v1257_v37 = vld [vmem:[%s1660_s8 + $0x8] sm:$0xff]  }
 0x4b2   :  { %1140 = vmatpush3.bf16.msra.mxu0 %v1257_v37 }
 0x4b3   :  { %v506_v55 = vmul.f32 %v505_v49, %v500_v51  ;;  %1141 = vmatprep.subr.bf16.mxu0 %v1400_v60  ;;  %v714_v51 = vrot.slane %v536_v11, %v504_v47 }
 0x4b4   :  { %v1267_v52 = vpop.eup %1266 }
 0x4b5   :  { %v501_v54 = vmul.f32 %v1267_v52, %v487_v39  ;;  %v512_v57 = vadd.f32 %v511_v53, %v506_v55  ;;  %v1259_v39 = vld [vmem:[%s1660_s8 + $0x18] sm:$0xff]   ;;  %v720_v55 = vrot.slane %v536_v11, %v510_v50 }
 0x4b6   :  { %1142 = vmatpush3.bf16.msra.mxu0 %v1258_v38 }
 0x4b7   :  { %v507_v56 = vmul.f32 %v505_v49, %v501_v54  ;;  %1143 = vmatprep.subr.bf16.mxu0 %v1400_v60 }
 0x4b9   :  { %v513_v58 = vadd.f32 %v511_v53, %v507_v56 }
 0x4ba   :  { %1144 = vmatpush3.bf16.msra.mxu0 %v1259_v39 }
 0x4bb   :  { %v539_v59 = vpack.c.bf16 %v513_v58, %v512_v57  ;;  %1145 = vmatprep.subr.bf16.mxu0 %v1400_v60 }
 0x4bd   :  { %1106 = vmatpush3.bf16.msra.mxu1 %v539_v59 }
 0x4be   :  { %1111 = vmatprep.subr.bf16.mxu1 %v1400_v60  ;;  %1146 = vmatpush3.bf16.msra.mxu0 %v1260_v40 }
 0x4bf   :  { %1147 = vmatprep.subr.bf16.mxu0 %v1400_v60 }
 0x4c0   :  { %1108 = vmatmul.mubr.msk.bf16.vlgmr.msra.gmra.mrb[8].mxu1 %vm333_vm5, %v1247_v61 }
 0x4c1   :  { %1112 = vmatpush3.bf16.msra.mxu1 %v1248_v62  ;;  %1127 = vmatprep.mubr.msk.bf16.mxu1 %vm1401_vm4, %v1400_v60 }
 0x4c2   :  { %1113 = vmatprep.subr.bf16.mxu1 %v1400_v60  ;;  %1148 = vmatpush3.bf16.msra.mxu0 %v1261_v41 }
 0x4c3   :  { %1149 = vmatprep.subr.bf16.mxu0 %v1400_v60 }
 0x4c5   :  { %1114 = vmatpush3.bf16.msra.mxu1 %v1249_v63 }
 0x4c6   :  { %1115 = vmatprep.subr.bf16.mxu1 %v1400_v60  ;;  %1150 = vmatpush3.bf16.msra.mxu0 %v1262_v42 }
 0x4c7   :  { %1151 = vmatprep.subr.bf16.mxu0 %v1400_v60 }
 0x4c9   :  { %1116 = vmatpush3.bf16.msra.mxu1 %v1250_v0 }
 0x4ca   :  { %1117 = vmatprep.subr.bf16.mxu1 %v1400_v60  ;;  %1152 = vmatpush3.bf16.msra.mxu0 %v1263_v16 }
 0x4cd   :  { %1118 = vmatpush3.bf16.msra.mxu1 %v1251_v1 }
 0x4ce   :  { %1119 = vmatprep.subr.bf16.mxu1 %v1400_v60 }
 0x4d1   :  { %1120 = vmatpush3.bf16.msra.mxu1 %v1252_v2 }
 0x4d2   :  { %1121 = vmatprep.subr.bf16.mxu1 %v1400_v60 }
 0x4d5   :  { %1122 = vmatpush3.bf16.msra.mxu1 %v1253_v3 }
 0x4d6   :  { %1123 = vmatprep.subr.bf16.mxu1 %v1400_v60 }
 0x4d9   :  { %1124 = vmatpush3.bf16.msra.mxu1 %v1254_v4 }
 0x4da   :  { %1125 = vmatprep.subr.bf16.mxu1 %v1400_v60 }
 0x4dd   :  { %1126 = vmatpush3.bf16.msra.mxu1 %v1255_v5 }
 0x4de   :  { %1131 = vmatprep.subr.bf16.mxu1 %v1400_v60 }
 0x593   :  { %v582_v6 = vpop.f32.mrb[8].mxu1 }
 0x594   :  { %v1109_v7 = vpop.f32.mrb[9].mxu1 }
 0x595   :  { %v585_v8 = vpop.f32.mrb[10].mxu1 }
 0x596   :  { %v589_v9 = vpack.c.bf16 %v585_v8, %v582_v6  ;;  %v1110_v10 = vpop.f32.mrb[11].mxu1 }
 0x598   :  { %1128 = vmatmul.mubr.bf16.vlgmr.msra.gmra.mrb[12].mxu1 %v589_v9 }
 0x599   :  { %1133 = vmatprep.mubr.msk.bf16.mxu1 %vm1401_vm4, %v1400_v60 }
 0x66b   :  { %v676_v13 = vpop.f32.mrb[12].mxu1 }
 0x66c   :  { %v677_v14 = vadd.f32 %v676_v13, %v593_v12  ;;  %v1129_v15 = vpop.f32.mrb[13].mxu1 }
 0x66d   :  { %v679_v18 = vpop.f32.mrb[14].mxu1 }
 0x66e   :  { %v683_v19 = vmax.f32 %v677_v14, 0.0  ;;  %v680_v20 = vadd.f32 %v679_v18, %v593_v12  ;;  %v1130_v21 = vpop.f32.mrb[15].mxu1 }
 0x670   :  { %v684_v22 = vmax.f32 %v680_v20, 0.0  ;;  %v685_v23 = vadd.f32 %v683_v19, %v512_v57 }
 0x672   :  { %687 = vadd.xlane.f32.xlu1 %v685_v23  ;;  %v686_v24 = vadd.f32 %v684_v22, %v513_v58 }
 0x674   :  { %689 = vadd.xlane.f32.xlu0 %v686_v24 }
 0x6ff   :  { %v688_v25 = vpop.xlane.xlu1 %687 }
 0x700   :  { %v691_v26 = vmul.f32 0.03125, %v688_v25 }
 0x701   :  { %v690_v27 = vpop.xlane.xlu0 %689 }
 0x702   :  { %v693_v28 = vsub.f32 %v685_v23, %v691_v26  ;;  %v692_v29 = vmul.f32 0.03125, %v690_v27 }
 0x704   :  { %v694_v30 = vsub.f32 %v686_v24, %v692_v29  ;;  %v695_v17 = vsel %vm305_vm6, %v693_v28, 0.0 }
 0x705   :  { %v697_v31 = vmul.f32 %v695_v17, %v695_v17 }
 0x706   :  { %v696_v32 = vsel %vm305_vm6, %v694_v30, 0.0 }
 0x707   :  { %699 = vadd.xlane.f32.xlu1 %v697_v31  ;;  %v698_v34 = vmul.f32 %v696_v32, %v696_v32 }
 0x709   :  { %701 = vadd.xlane.f32.xlu0 %v698_v34 }
 0x718   :  { %727 = vperm.xlu1 %1237, %v725_v35  }
 0x794   :  { %v700_v43 = vpop.xlane.xlu1 %699 }
 0x795   :  { %v703_v44 = vmul.f32 0.03125, %v700_v43 }
 0x796   :  { %v702_v45 = vpop.xlane.xlu0 %701 }
 0x797   :  { %v705_v46 = vadd.f32 1e-05, %v703_v44  ;;  %v704_v48 = vmul.f32 0.03125, %v702_v45 }
 0x798   :  { %v728_v57 = vpop.permute.xlu1 %727 }
 0x799   :  { %1268 = vrsqrt.f32 %v705_v46  ;;  %v706_v49 = vadd.f32 1e-05, %v704_v48  ;;  %vm729_vm7 = vcmp.eq.s32.totalorder %v728_v57, %v1530_v33 }
 0x79a   :  { %v930_v63 = vsel %vm729_vm7, 1.0, %v1400_v60 }
 0x79b   :  { %1270 = vrsqrt.f32 %v706_v49  ;;  %v732_v1 = vpack.c.bf16 %v930_v63, %v930_v63 }
 0x7a3   :  { %v1269_v52 = vpop.eup %1268 }
 0x7a4   :  { %v709_v53 = vmul.f32 %v1269_v52, %v695_v17 }
 0x7a5   :  { %v1271_v54 = vpop.eup %1270 }
 0x7a6   :  { %v710_v56 = vmul.f32 %v1271_v54, %v696_v32  ;;  %v715_v58 = vmul.f32 %v714_v51, %v709_v53 }
 0x7a8   :  { %v716_v59 = vmul.f32 %v714_v51, %v710_v56  ;;  %v721_v61 = vadd.f32 %v720_v55, %v715_v58 }
 0x7aa   :  { %v722_v62 = vadd.f32 %v720_v55, %v716_v59 }
 0x7ac   :  { %v735_v0 = vpack.c.bf16 %v722_v62, %v721_v61 }
 0x7ae   :  { %1132 = vmatpush3.bf16.msra.mxu1 %v735_v0 }
 0x7b1   :  { %1134 = vmatmul.mubr.msk.bf16.vlgmr.msra.gmra.mrb[16].mxu1 %vm333_vm5, %v732_v1 }
 0x884   :  { %v773_v47 = vpop.f32.mrb[16].mxu1 }
 0x885   :  { %v779_v50 = vpack.c.bf16 %v773_v47, %v773_v47  ;;  %v1135_v2 = vpop.f32.mrb[17].mxu1 }
 0x886   :  { %v776_v3 = vpop.f32.mrb[18].mxu1 }
 0x887   :  { %v1136_v4 = vpop.f32.mrb[19].mxu1  ;;  %1154 = vmatmul.mubr.bf16.vlgmr.msra.gmra.mrb[4].mxu0 %v779_v50 }
 0x95a   :  { %v878_v33 = vpop.f32.mrb[4].mxu0 }
 0x95b   :  { %884 = vst [vmem:[#allocation11] sm:$0xff] %v878_v33  ;;  %v1155_v60 = vpop.f32.mrb[5].mxu0 }
 0x95c   :  { %v881_v5 = vpop.f32.mrb[6].mxu0 }
 0x95d   :  { %1371 = shalt.err (!%p1368_p8)
}
 0x95e   :  { %s1372_s7 = scalar_lea.hbm %s1661_s9, 128 }
 0x95f   :  { %p1373_p9 = scmp.ne.s32.totalorder %s1661_s9, %s1372_s7  ;;  %p1376_p10 = scmp.lt.u32.totalorder %s1372_s7, %s1661_s9 }
 0x961   :  { %p1378_p11 = pnand %p1376_p10, %p1373_p9 }
 0x963   :  { %1381 = shalt.err (!%p1378_p11)
}
 0x964   :  { %894 = dma.vmem_to_hbm [thread:$0]  %s892_s20, 128, %s1661_s9, [#allocation5]   ;;  %v1156_v6 = vpop.f32.mrb[7].mxu0 }
 0x965   :  { %1388 = dma.done.wait [#allocation5], 128  }
 0x966   :  { %1389 = vsyncadd [#allocation5], 4294967168 }
 0x967   :  { %898 = vsyncpa [#allocation4], 1 }
 0x968   :  { %899 = vsyncpa [#allocation7], 1 }
 0x969   :  { %900 = vsyncpa [#allocation10], 1 }
 0x96a   :  { %901 = vsyncpa [#allocation5], 1 }

</bundles_post_ra>
